<compile_context>
chip_gen: v5e
topology: v5e:2x2
jax: 0.10.0
libtpu: 0.0.40
codegen_flags: <defaults>
</compile_context>

<pallas_src>
import jax
import jax.numpy as jnp
from jax import lax
from jax.experimental import pallas as pl
from jax.experimental.pallas import tpu as pltpu

EPS = 1e-5
NEG_SLOPE = 0.1

# Matmul operand dtype.  Switching to jnp.bfloat16 halves HBM/VMEM traffic and
# unlocks the bf16 MXU path on v6e/v7x (accumulation stays f32 via
# preferred_element_type); kept at f32 here so the 1e-3 check against the f32
# reference stays tight.
MATMUL_DTYPE = jnp.float32

VMEM_LIMIT_BYTES = 32 * 1024 * 1024   # v7x-safe (64 MiB physical, 32 MiB scoped default)
VMEM_TILE_BUDGET = 20 * 1024 * 1024   # tile-size budget, leaves headroom under the limit


def _leaky(v):
    return jnp.where(v >= 0, v, NEG_SLOPE * v)


# --------------------------------------------------------------------------
# stage 1: conv1 (1x1) + LeakyReLU, BN1 partial stats, W-padded output + halos
# --------------------------------------------------------------------------
def _stage1_kernel(x_ref, w1_ref, h1p_ref, first_ref, last_ref, st1_ref):
    _, TH, W, Cin = x_ref.shape
    Cout = w1_ref.shape[1]

    x2d = x_ref[...].reshape(TH * W, Cin)
    h = jnp.dot(x2d.astype(MATMUL_DTYPE), w1_ref[...].astype(MATMUL_DTYPE),
                preferred_element_type=jnp.float32)
    h = _leaky(h)

    # BN1 partial statistics for this tile (reduced on the host afterwards).
    s = jnp.sum(h, axis=0, keepdims=True)
    sq = jnp.sum(h * h, axis=0, keepdims=True)
    st1_ref[...] = jnp.concatenate([s, sq], axis=0).reshape(1, 1, 2, Cout)

    # W-padded layout (one zero column left/right) so conv2 only needs H halos.
    h3 = h.reshape(TH, W, Cout)
    zc = jnp.zeros((TH, 1, Cout), jnp.float32)
    hp = jnp.concatenate([zc, h3, zc], axis=1)          # (TH, W+2, Cout)
    h1p_ref[...] = hp.reshape(1, TH, W + 2, Cout)

    # First / last rows of this tile = halo rows for the neighbouring tiles.
    first_ref[...] = hp[0:1].reshape(1, 1, W + 2, Cout)
    last_ref[...] = hp[TH - 1:TH].reshape(1, 1, W + 2, Cout)


# --------------------------------------------------------------------------
# stage 2: BN1-apply + conv2 (3x3, single im2col matmul) + LeakyReLU + BN2 stats
# --------------------------------------------------------------------------
def _stage2_kernel(h1_ref, top_ref, bot_ref, w2f_ref, s1_ref, t1_ref,
                   h2_ref, st2_ref):
    ih = pl.program_id(1)
    nh = pl.num_programs(1)
    _, TH, Wp, Cout = h1_ref.shape
    W = Wp - 2
    C2 = h2_ref.shape[3]

    # (TH+2, W+2, Cout) working slab: halo row / tile rows / halo row.
    vals = jnp.concatenate(
        [top_ref[...].reshape(1, Wp, Cout),
         h1_ref[...].reshape(TH, Wp, Cout),
         bot_ref[...].reshape(1, Wp, Cout)], axis=0)

    # Apply BN1 (precomputed scale/shift) only on valid positions: conv2's
    # zero padding pads the *BN1 output*, so padding must stay exactly zero.
    ri = lax.broadcasted_iota(jnp.int32, (TH + 2, Wp, 1), 0)
    ci = lax.broadcasted_iota(jnp.int32, (TH + 2, Wp, 1), 1)
    row_ok = (((ri >= 1) & (ri <= TH))
              | ((ri == 0) & (ih > 0))
              | ((ri == TH + 1) & (ih < nh - 1)))
    col_ok = (ci >= 1) & (ci <= W)
    vals = jnp.where(row_ok & col_ok, vals * s1_ref[...] + t1_ref[...], 0.0)

    # im2col: one (TH*W, 9*Cout) x (9*Cout, C2) matmul; accumulation in the MXU.
    taps = [vals[dy:dy + TH, dx:dx + W, :] for dy in range(3) for dx in range(3)]
    p2d = jnp.concatenate(taps, axis=-1).reshape(TH * W, 9 * Cout)
    acc = jnp.dot(p2d.astype(MATMUL_DTYPE), w2f_ref[...].astype(MATMUL_DTYPE),
                  preferred_element_type=jnp.float32)
    acc = _leaky(acc)

    s = jnp.sum(acc, axis=0, keepdims=True)
    sq = jnp.sum(acc * acc, axis=0, keepdims=True)
    st2_ref[...] = jnp.concatenate([s, sq], axis=0).reshape(1, 1, 2, C2)
    h2_ref[...] = acc.reshape(1, TH, W, C2)


# --------------------------------------------------------------------------
# stage 3: BN2-apply + residual add (lane-dense (rows, W*C2) blocks)
# --------------------------------------------------------------------------
def _stage3_kernel(h2_ref, x_ref, s2_ref, t2_ref, out_ref):
    out_ref[...] = h2_ref[...] * s2_ref[...] + t2_ref[...] + x_ref[...]


# --------------------------------------------------------------------------
# tile-size selection (budgeted against v7x VMEM)
# --------------------------------------------------------------------------
def _pick_tile_h(H, W, Cin, Cout, C2, budget_bytes=VMEM_TILE_BUDGET):
    def est(th):
        per_row = (2 * (W + 2) * Cout    # double-buffered h1 block
                   + 2 * W * C2          # double-buffered h2 block
                   + (W + 2) * Cout      # BN1-applied slab
                   + 9 * W * Cout        # im2col patches
                   + 2 * W * C2          # acc + epilogue
                   + 2 * W * Cin)        # stage-1 input block (double-buffered)
        return 4 * th * per_row + 4 * 9 * Cout * C2
    cands = [t for t in range(H, 0, -1) if H % t == 0 and (t % 8 == 0 or t == H)]
    for t in cands:
        if est(t) <= budget_bytes:
            return t
    return cands[-1]


def _pick_tile_rows(nrows, wc, budget_bytes=VMEM_TILE_BUDGET):
    cands = [t for t in range(nrows, 0, -1)
             if nrows % t == 0 and (t % 8 == 0 or t == nrows)]
    for t in cands:
        if 4 * t * wc * 6 <= budget_bytes:   # 3 blocks x double buffer
            return t
    return cands[-1]


# --------------------------------------------------------------------------
# wrappers
# --------------------------------------------------------------------------
def basic_block_nhwc(x_nhwc, params):
    """x_nhwc: (N, H, W, Cin) float32 -> (N, H, W, Cin) float32."""
    w1, g1, b1, w2, g2, b2 = params
    N, H, W, Cin = x_nhwc.shape
    Cout = w1.shape[0]                       # conv1: (Cout, Cin, 1, 1)
    C2 = w2.shape[0]                         # conv2: (C2, Cout, 3, 3)
    assert Cin == C2, "residual add requires in_channels == 2*out_channels"
    assert C2 == 2 * Cout

    x = x_nhwc.astype(jnp.float32)
    # Wrapper-side weight plumbing (free relative to in-kernel shuffles).
    w1k = jnp.transpose(w1[:, :, 0, 0], (1, 0)).astype(jnp.float32)      # (Cin, Cout)
    w2f = jnp.transpose(w2, (2, 3, 1, 0)).reshape(9 * Cout, C2)          # (9*Cout, C2)
    w2f = w2f.astype(jnp.float32)

    TH = _pick_tile_h(H, W, Cin, Cout, C2)
    HB = H // TH
    Wp = W + 2
    cparams = pltpu.CompilerParams(
        dimension_semantics=("parallel", "parallel"),
        vmem_limit_bytes=VMEM_LIMIT_BYTES)

    # ---- stage 1 ----
    h1p, first_row, last_row, stats1 = pl.pallas_call(
        _stage1_kernel,
        grid=(N, HB),
        in_specs=[
            pl.BlockSpec((1, TH, W, Cin), lambda n, i: (n, i, 0, 0)),
            pl.BlockSpec((Cin, Cout), lambda n, i: (0, 0)),
        ],
        out_specs=[
            pl.BlockSpec((1, TH, Wp, Cout), lambda n, i: (n, i, 0, 0)),
            pl.BlockSpec((1, 1, Wp, Cout), lambda n, i: (n, i, 0, 0)),
            pl.BlockSpec((1, 1, Wp, Cout), lambda n, i: (n, i, 0, 0)),
            pl.BlockSpec((1, 1, 2, Cout), lambda n, i: (n, i, 0, 0)),
        ],
        out_shape=[
            jax.ShapeDtypeStruct((N, H, Wp, Cout), jnp.float32),
            jax.ShapeDtypeStruct((N, HB, Wp, Cout), jnp.float32),   # first rows
            jax.ShapeDtypeStruct((N, HB, Wp, Cout), jnp.float32),   # last rows
            jax.ShapeDtypeStruct((N, HB, 2, Cout), jnp.float32),
        ],
        compiler_params=cparams,
    )(x, w1k)

    # ---- BN1: reduce partial stats, fold into scale/shift (tiny XLA ops) ----
    cnt = float(N * H * W)
    mean1 = jnp.sum(stats1[:, :, 0, :], axis=(0, 1)) / cnt
    var1 = jnp.sum(stats1[:, :, 1, :], axis=(0, 1)) / cnt - mean1 * mean1
    scale1 = g1.astype(jnp.float32) * lax.rsqrt(var1 + EPS)
    shift1 = b1.astype(jnp.float32) - mean1 * scale1

    # ---- stage 2 ----
    h2, stats2 = pl.pallas_call(
        _stage2_kernel,
        grid=(N, HB),
        in_specs=[
            pl.BlockSpec((1, TH, Wp, Cout), lambda n, i: (n, i, 0, 0)),
            # top halo = last row of tile i-1 (clamped; masked when invalid)
            pl.BlockSpec((1, 1, Wp, Cout),
                         lambda n, i: (n, jnp.maximum(i - 1, 0), 0, 0)),
            # bottom halo = first row of tile i+1 (clamped; masked when invalid)
            pl.BlockSpec((1, 1, Wp, Cout),
                         lambda n, i: (n, jnp.minimum(i + 1, HB - 1), 0, 0)),
            pl.BlockSpec((9 * Cout, C2), lambda n, i: (0, 0)),
            pl.BlockSpec((1, 1, Cout), lambda n, i: (0, 0, 0)),
            pl.BlockSpec((1, 1, Cout), lambda n, i: (0, 0, 0)),
        ],
        out_specs=[
            pl.BlockSpec((1, TH, W, C2), lambda n, i: (n, i, 0, 0)),
            pl.BlockSpec((1, 1, 2, C2), lambda n, i: (n, i, 0, 0)),
        ],
        out_shape=[
            jax.ShapeDtypeStruct((N, H, W, C2), jnp.float32),
            jax.ShapeDtypeStruct((N, HB, 2, C2), jnp.float32),
        ],
        compiler_params=cparams,
    )(h1p, last_row, first_row, w2f,
      scale1.reshape(1, 1, Cout), shift1.reshape(1, 1, Cout))

    # ---- BN2: reduce partial stats ----
    mean2 = jnp.sum(stats2[:, :, 0, :], axis=(0, 1)) / cnt
    var2 = jnp.sum(stats2[:, :, 1, :], axis=(0, 1)) / cnt - mean2 * mean2
    scale2 = g2.astype(jnp.float32) * lax.rsqrt(var2 + EPS)
    shift2 = b2.astype(jnp.float32) - mean2 * scale2

    # ---- stage 3 (lane-dense: fold W into the lane dim; free HBM reshape) ----
    NH, WC = N * H, W * C2
    h2f = h2.reshape(NH, WC)
    xf = x.reshape(NH, W * Cin)                       # Cin == C2, same folding
    scale2t = jnp.tile(scale2, W).reshape(1, WC)
    shift2t = jnp.tile(shift2, W).reshape(1, WC)
    TR = _pick_tile_rows(NH, WC)

    out = pl.pallas_call(
        _stage3_kernel,
        grid=(NH // TR,),
        in_specs=[
            pl.BlockSpec((TR, WC), lambda r: (r, 0)),
            pl.BlockSpec((TR, WC), lambda r: (r, 0)),
            pl.BlockSpec((1, WC), lambda r: (0, 0)),
            pl.BlockSpec((1, WC), lambda r: (0, 0)),
        ],
        out_specs=pl.BlockSpec((TR, WC), lambda r: (r, 0)),
        out_shape=jax.ShapeDtypeStruct((NH, WC), jnp.float32),
        compiler_params=pltpu.CompilerParams(
            dimension_semantics=("parallel",),
            vmem_limit_bytes=VMEM_LIMIT_BYTES),
    )(h2f, xf, scale2t, shift2t)

    return out.reshape(N, H, W, C2)


def basic_block(x_nchw, params):
    """PyTorch-style NCHW entry point."""
    # TODO(synk): if the surrounding model already runs in NHWC, call
    # basic_block_nhwc directly and these two boundary transposes (a full HBM
    # round-trip each) disappear.
    x = jnp.transpose(x_nchw, (0, 2, 3, 1))
    out = basic_block_nhwc(x, params)
    return jnp.transpose(out, (0, 3, 1, 2))


# --------------------------------------------------------------------------
# pure-JAX reference (lax.conv) for correctness checking
# --------------------------------------------------------------------------
def basic_block_reference(x_nchw, params):
    w1, g1, b1, w2, g2, b2 = params

    def bn(v, g, b):
        mean = jnp.mean(v, axis=(0, 2, 3), keepdims=True)
        var = jnp.mean((v - mean) ** 2, axis=(0, 2, 3), keepdims=True)
        return ((v - mean) / jnp.sqrt(var + EPS)
                * g.reshape(1, -1, 1, 1) + b.reshape(1, -1, 1, 1))

    dn = ('NCHW', 'OIHW', 'NCHW')
    out = jax.lax.conv_general_dilated(x_nchw, w1, (1, 1), 'VALID',
                                       dimension_numbers=dn)
    out = bn(_leaky(out), g1, b1)
    out = jax.lax.conv_general_dilated(out, w2, (1, 1), ((1, 1), (1, 1)),
                                       dimension_numbers=dn)
    out = bn(_leaky(out), g2, b2)
    return out + x_nchw


if __name__ == "__main__":
    # Residual add requires in_channels == 2 * out_channels.
    N, H, W = 2, 16, 16
    in_channels, out_channels = 8, 4

    key = jax.random.PRNGKey(0)
    kx, kw1, kw2, kg1, kb1, kg2, kb2 = jax.random.split(key, 7)

    x = jax.random.normal(kx, (N, in_channels, H, W), dtype=jnp.float32)
    w1 = jax.random.normal(kw1, (out_channels, in_channels, 1, 1),
                           dtype=jnp.float32) * 0.2
    w2 = jax.random.normal(kw2, (2 * out_channels, out_channels, 3, 3),
                           dtype=jnp.float32) * 0.1
    g1 = 1.0 + 0.1 * jax.random.normal(kg1, (out_channels,), dtype=jnp.float32)
    b1 = 0.1 * jax.random.normal(kb1, (out_channels,), dtype=jnp.float32)
    g2 = 1.0 + 0.1 * jax.random.normal(kg2, (2 * out_channels,), dtype=jnp.float32)
    b2 = 0.1 * jax.random.normal(kb2, (2 * out_channels,), dtype=jnp.float32)
    params = (w1, g1, b1, w2, g2, b2)

    out = jax.block_until_ready(basic_block(x, params))
    ref = jax.block_until_ready(basic_block_reference(x, params))

    assert out.shape == (N, in_channels, H, W)
    assert jnp.allclose(out, ref, rtol=1e-3, atol=1e-3), (
        float(jnp.max(jnp.abs(out - ref))))

    print("KERNEL_OK")
</pallas_src>

<mosaic_0001>
module attributes {stable_mosaic.version = 11 : i64} {
  func.func @_stage1_kernel(%arg0: i32, %arg1: i32, %arg2: memref<1x16x16x8xf32, #tpu.memory_space<vmem>>, %arg3: memref<8x4xf32, #tpu.memory_space<vmem>>, %arg4: memref<1x16x18x4xf32, #tpu.memory_space<vmem>>, %arg5: memref<1x1x18x4xf32, #tpu.memory_space<vmem>>, %arg6: memref<1x1x18x4xf32, #tpu.memory_space<vmem>>, %arg7: memref<1x1x2x4xf32, #tpu.memory_space<vmem>>) attributes {dimension_semantics = [#tpu.dimension_semantics<parallel>, #tpu.dimension_semantics<parallel>], iteration_bounds = array<i64: 2, 1>, scalar_prefetch = 0 : i64, scratch_operands = 0 : i64, tpu.core_type = #tpu.core_type<tc>, window_params = [{transform_indices = @transform_0, window_bounds = array<i64: 1, 16, 16, 8>}, {pipeline_mode = #tpu.pipeline_mode<synchronous>, transform_indices = @transform_1, window_bounds = array<i64: 8, 4>}, {transform_indices = @transform_2, window_bounds = array<i64: 1, 16, 18, 4>}, {transform_indices = @transform_3, window_bounds = array<i64: 1, 1, 18, 4>}, {transform_indices = @transform_4, window_bounds = array<i64: 1, 1, 18, 4>}, {transform_indices = @transform_5, window_bounds = array<i64: 1, 1, 2, 4>}]} {
    %c0 = arith.constant 0 : index
    %c0_0 = arith.constant 0 : index
    %c0_1 = arith.constant 0 : index
    %c0_2 = arith.constant 0 : index
    %0 = vector.load %arg2[%c0, %c0_0, %c0_1, %c0_2] : memref<1x16x16x8xf32, #tpu.memory_space<vmem>>, vector<1x16x16x8xf32>
    %1 = vector.shape_cast %0 : vector<1x16x16x8xf32> to vector<256x8xf32>
    %c0_3 = arith.constant 0 : index
    %c0_4 = arith.constant 0 : index
    %2 = vector.load %arg3[%c0_3, %c0_4] : memref<8x4xf32, #tpu.memory_space<vmem>>, vector<8x4xf32>
    %cst = arith.constant dense<0.000000e+00> : vector<256x4xf32>
    %3 = tpu.matmul %1, %2, %cst {dimension_numbers = #tpu.dot_dimension_numbers<[1], [0], [0], [1], [0, 0, 1, 1], [], []>} : vector<256x8xf32>, vector<8x4xf32>, vector<256x4xf32> -> vector<256x4xf32>
    %cst_5 = arith.constant 0.000000e+00 : f32
    %4 = vector.broadcast %cst_5 : f32 to vector<256x4xf32>
    %5 = arith.cmpf oge, %3, %4 : vector<256x4xf32>
    %cst_6 = arith.constant 1.000000e-01 : f32
    %6 = vector.broadcast %cst_6 : f32 to vector<256x4xf32>
    %7 = arith.mulf %6, %3 : vector<256x4xf32>
    %8 = arith.select %5, %3, %7 : vector<256x4xi1>, vector<256x4xf32>
    %cst_7 = arith.constant dense<0.000000e+00> : vector<4xf32>
    %9 = vector.multi_reduction <add>, %8, %cst_7 [0] : vector<256x4xf32> to vector<4xf32>
    %10 = vector.shape_cast %9 : vector<4xf32> to vector<1x4xf32>
    %11 = arith.mulf %8, %8 : vector<256x4xf32>
    %cst_8 = arith.constant dense<0.000000e+00> : vector<4xf32>
    %12 = vector.multi_reduction <add>, %11, %cst_8 [0] : vector<256x4xf32> to vector<4xf32>
    %13 = vector.shape_cast %12 : vector<4xf32> to vector<1x4xf32>
    %14 = tpu.concatenate %10, %13 in 0 : vector<1x4xf32>, vector<1x4xf32> -> vector<2x4xf32>
    %15 = vector.shape_cast %14 : vector<2x4xf32> to vector<1x1x2x4xf32>
    %c0_9 = arith.constant 0 : index
    %c0_10 = arith.constant 0 : index
    %c0_11 = arith.constant 0 : index
    %c0_12 = arith.constant 0 : index
    %16 = vector.load %arg7[%c0_9, %c0_10, %c0_11, %c0_12] : memref<1x1x2x4xf32, #tpu.memory_space<vmem>>, vector<1x1x2x4xf32>
    tpu.vector_store %arg7[%c0_9, %c0_10, %c0_11, %c0_12], %15 {strides = array<i32>} : memref<1x1x2x4xf32, #tpu.memory_space<vmem>>, vector<1x1x2x4xf32>,
    %17 = vector.shape_cast %8 : vector<256x4xf32> to vector<16x16x4xf32>
    %cst_13 = arith.constant 0.000000e+00 : f32
    %18 = vector.broadcast %cst_13 : f32 to vector<16x1x4xf32>
    %19 = tpu.concatenate %18, %17, %18 in 1 : vector<16x1x4xf32>, vector<16x16x4xf32>, vector<16x1x4xf32> -> vector<16x18x4xf32>
    %20 = vector.shape_cast %19 : vector<16x18x4xf32> to vector<1x16x18x4xf32>
    %c0_14 = arith.constant 0 : index
    %c0_15 = arith.constant 0 : index
    %c0_16 = arith.constant 0 : index
    %c0_17 = arith.constant 0 : index
    %21 = vector.load %arg4[%c0_14, %c0_15, %c0_16, %c0_17] : memref<1x16x18x4xf32, #tpu.memory_space<vmem>>, vector<1x16x18x4xf32>
    tpu.vector_store %arg4[%c0_14, %c0_15, %c0_16, %c0_17], %20 {strides = array<i32>} : memref<1x16x18x4xf32, #tpu.memory_space<vmem>>, vector<1x16x18x4xf32>,
    %22 = vector.extract_strided_slice %19 {offsets = [0, 0, 0], sizes = [1, 18, 4], strides = [1, 1, 1]} : vector<16x18x4xf32> to vector<1x18x4xf32>
    %23 = vector.shape_cast %22 : vector<1x18x4xf32> to vector<1x1x18x4xf32>
    %c0_18 = arith.constant 0 : index
    %c0_19 = arith.constant 0 : index
    %c0_20 = arith.constant 0 : index
    %c0_21 = arith.constant 0 : index
    %24 = vector.load %arg5[%c0_18, %c0_19, %c0_20, %c0_21] : memref<1x1x18x4xf32, #tpu.memory_space<vmem>>, vector<1x1x18x4xf32>
    tpu.vector_store %arg5[%c0_18, %c0_19, %c0_20, %c0_21], %23 {strides = array<i32>} : memref<1x1x18x4xf32, #tpu.memory_space<vmem>>, vector<1x1x18x4xf32>,
    %25 = vector.extract_strided_slice %19 {offsets = [15, 0, 0], sizes = [1, 18, 4], strides = [1, 1, 1]} : vector<16x18x4xf32> to vector<1x18x4xf32>
    %26 = vector.shape_cast %25 : vector<1x18x4xf32> to vector<1x1x18x4xf32>
    %c0_22 = arith.constant 0 : index
    %c0_23 = arith.constant 0 : index
    %c0_24 = arith.constant 0 : index
    %c0_25 = arith.constant 0 : index
    %27 = vector.load %arg6[%c0_22, %c0_23, %c0_24, %c0_25] : memref<1x1x18x4xf32, #tpu.memory_space<vmem>>, vector<1x1x18x4xf32>
    tpu.vector_store %arg6[%c0_22, %c0_23, %c0_24, %c0_25], %26 {strides = array<i32>} : memref<1x1x18x4xf32, #tpu.memory_space<vmem>>, vector<1x1x18x4xf32>,
    return
  }
  func.func @transform_0(%arg0: i32, %arg1: i32) -> (i32, i32, i32, i32) {
    %c0_i32 = arith.constant 0 : i32
    %c0_i32_0 = arith.constant 0 : i32
    %c0_i32_1 = arith.constant 0 : i32
    return %arg0, %arg1, %c0_i32, %c0_i32_0 : i32, i32, i32, i32
  }
  func.func @transform_1(%arg0: i32, %arg1: i32) -> (i32, i32) {
    %c0_i32 = arith.constant 0 : i32
    %c0_i32_0 = arith.constant 0 : i32
    %c0_i32_1 = arith.constant 0 : i32
    return %c0_i32, %c0_i32_0 : i32, i32
  }
  func.func @transform_2(%arg0: i32, %arg1: i32) -> (i32, i32, i32, i32) {
    %c0_i32 = arith.constant 0 : i32
    %c0_i32_0 = arith.constant 0 : i32
    %c0_i32_1 = arith.constant 0 : i32
    return %arg0, %arg1, %c0_i32, %c0_i32_0 : i32, i32, i32, i32
  }
  func.func @transform_3(%arg0: i32, %arg1: i32) -> (i32, i32, i32, i32) {
    %c0_i32 = arith.constant 0 : i32
    %c0_i32_0 = arith.constant 0 : i32
    %c0_i32_1 = arith.constant 0 : i32
    return %arg0, %arg1, %c0_i32, %c0_i32_0 : i32, i32, i32, i32
  }
  func.func @transform_4(%arg0: i32, %arg1: i32) -> (i32, i32, i32, i32) {
    %c0_i32 = arith.constant 0 : i32
    %c0_i32_0 = arith.constant 0 : i32
    %c0_i32_1 = arith.constant 0 : i32
    return %arg0, %arg1, %c0_i32, %c0_i32_0 : i32, i32, i32, i32
  }
  func.func @transform_5(%arg0: i32, %arg1: i32) -> (i32, i32, i32, i32) {
    %c0_i32 = arith.constant 0 : i32
    %c0_i32_0 = arith.constant 0 : i32
    %c0_i32_1 = arith.constant 0 : i32
    return %arg0, %arg1, %c0_i32, %c0_i32_0 : i32, i32, i32, i32
  }
}

</mosaic_0001>

<bundles_post_ra>
// kernel: tpu_custom_call.1
= control target key start
LH: loop header
LB: loop body
LE: loop exit
PB: predicated region body
PF: predicated region fallthrough
CT: control target
= control target key end

     0   :  { %11 = vsyncpa [#allocation3], 0  ;;  %s2178_s0 = inlined_call_operand.vmem [shape: f32[2,16,16,8], index: 0, kind: input, shape index: {}]   ;;  %s2179_s1 = inlined_call_operand.vmem [shape: f32[8,4], index: 1, kind: input, shape index: {}]   ;;  %s2180_s2 = inlined_call_operand.vmem [shape: f32[2,16,18,4], index: 2, kind: output, shape index: {0}]   ;;  %s2181_s3 = inlined_call_operand.vmem [shape: f32[2,1,18,4], index: 3, kind: output, shape index: {1}]   ;;  %s2182_s4 = inlined_call_operand.vmem [shape: f32[2,1,18,4], index: 4, kind: output, shape index: {2}]   ;;  %s2183_s5 = inlined_call_operand.hbm [shape: f32[2,1,2,4], index: 5, kind: output, shape index: {3}]  }
   0x1   :  { %13 = vsyncpa [#allocation3 + $0x1], 0  ;;  %s1528_s18 = smov 0   ;;  %s1530_s19 = smov 0  }
   0x2   :  { %s1532_s20 = smov 0   ;;  %s1534_s21 = smov 0  }
   0x3   :  { %s1536_s22 = smov 0   ;;  %s1538_s23 = smov 0  }
   0x4 LB: > { %s1310_s24 = sadd.s32 4294967295, %s1496_s23   ;;  %s1311_s25 = sadd.s32 4294967294, %s1496_s23   ;;  %s1496_s23 = sphi %s1538_s23, %s19_s23   ;;  %s1492_s22 = sphi %s1536_s22, %s2190_s22   ;;  %s1488_s21 = sphi %s1534_s21, %s2189_s21   ;;  %s1484_s20 = sphi %s1532_s20, %s2188_s20   ;;  %s1480_s19 = sphi %s1530_s19, %s2187_s19   ;;  %s1476_s18 = sphi %s1528_s18, %s2186_s18  }
   0x5   : > { %s31_s26 = sadd.s32 1, %s1492_s22  ;;  %s173_s27 = sadd.s32 1, %s1484_s20 }
   0x6   : > { %p33_p0 = scmp.ge.s32.totalorder %s31_s26, 2  ;;  %p183_p1 = scmp.ne.s32.totalorder %s1484_s20, %s1480_s19 }
   0x7   : > { %p184_p2 = scmp.eq.s32.totalorder %s1310_s24, 1  ;;  %p189_p3 = scmp.ne.s32.totalorder %s1480_s19, %s1476_s18 }
   0x8   : > { %s2192_s26 = smov (%p33_p0, %s31_s26), 0  ;;  %p190_p5 = scmp.eq.s32.totalorder %s1311_s25, 1 }
   0x9   : > { %p1568_p4 = por %p184_p2, %p183_p1  ;;  %s168_s29 = ssub.s32 %s1492_s22, %s2192_s26 }
   0xa   : > { %p1314_p6 = scmp.ge.s32.totalorder %s1496_s23, 1  ;;  %p171_p7 = scmp.eq.s32.totalorder %s168_s29, 0 }
   0xb   : > { %p1575_p8 = por %p190_p5, %p189_p3  ;;  %p225_p9 = scmp.lt.s32.totalorder %s1496_s23, 3 }
   0xc   : > { %s1581_s6 = scalar_select %p171_p7, %s1484_s20, %s173_s27  }
   0xd   : > { %p226_p10 = pnand %p1314_p6, %p225_p9 }
   0xe   : > { %p287_p11 = scmp.lt.s32.totalorder (!%p226_p10), %s1488_s21, 1  ;;  %s1354_s12 = sshll.u32 (!%p226_p10), %s1488_s21, 1 }
   0xf   : > { %229 = sbr.rel (%p226_p10) target bundleno = 279 (0x117), region = 28  ;;  %s1438_s8 = scalar_lea.hbm (!%p226_p10), %s2183_s5, 4 }
  0x14   : > { %v358_v0 = vld [vmem:[%s2179_s1] sm:$0xff]  ;;  %s1588_s9 = scalar_select %p287_p11, %s1488_s21, 1  ;;  %vm359_vm0 = vcmask 64512   ;;  %vm836_vm3 = vcmask 1040384   ;;  %vm665_vm4 = vcmask 31744   ;;  %vm838_vm8 = vcmask 25600  }
  0x15   : > { %471 = vmatpush.msra.mxu0 %v358_v0  ;;  %1358 = vmatpush.msra.mxu1 %v358_v0 }
  0x16   : > { %1359 = vmatpush.msra.mxu2 %v358_v0  ;;  %1360 = vmatpush.msra.mxu3 %v358_v0  ;;  %s1357_s10 = sshll.u32 %s1588_s9, 8  ;;  %s1361_s14 = smul.u32 384, %s1588_s9 }
  0x17   : > { %s1594_s13 = scalar_lea.vmem %s2178_s0, %s1357_s10  ;;  %s1362_s15 = smul.u32 24, %s1588_s9 }
  0x18   : > { %v326_v1 = vld [vmem:[%s1594_s13] sm:$0xff]  ;;  %v327_v5 = vld [vmem:[%s1594_s13 + $0x8] sm:$0xff]  ;;  %v328_v9 = vld [vmem:[%s1594_s13 + $0x10] sm:$0xff]  ;;  %s1669_s24 = scalar_lea.vmem %s2180_s2, %s1361_s14  ;;  %s283_s9 = sand.u32 1, %s1480_s19  }
  0x19   : > { %v334_v2 = vld [vmem:[%s1594_s13 + $0x40] sm:$0xff]  ;;  %1321 = vmatmul.msk.f32.vlgmr.msra.gmra.mxu0 %vm359_vm0, %v326_v1  ;;  %v335_v6 = vld [vmem:[%s1594_s13 + $0x48] sm:$0xff]  ;;  %v336_v10 = vld [vmem:[%s1594_s13 + $0x50] sm:$0xff]  ;;  %s1677_s29 = scalar_lea.vmem %s2181_s3, %s1362_s15  ;;  %s325_s10 = scalar_lea.vmem %s2182_s4, %s1362_s15 }
  0x1a   : > { %1329 = vmatmul.msk.f32.vlgmr.msra.gmra.mxu1 %vm359_vm0, %v334_v2  ;;  %v342_v3 = vld [vmem:[%s1594_s13 + $0x80] sm:$0xff]  ;;  %v343_v7 = vld [vmem:[%s1594_s13 + $0x88] sm:$0xff]  ;;  %v344_v11 = vld [vmem:[%s1594_s13 + $0x90] sm:$0xff]  ;;  %s1315_s11 = sshll.u32 %s283_s9, 1  ;;  %s1104_s15 = scalar_lea.hbm %s2183_s5, %s1354_s12 }
  0x1b   : > { %1337 = vmatmul.msk.f32.vlgmr.msra.gmra.mxu2 %vm359_vm0, %v342_v3  ;;  %v350_v4 = vld [vmem:[%s1594_s13 + $0xc0] sm:$0xff]  ;;  %v351_v8 = vld [vmem:[%s1594_s13 + $0xc8] sm:$0xff]  ;;  %v352_v12 = vld [vmem:[%s1594_s13 + $0xd0] sm:$0xff]  ;;  %s285_s16 = scalar_lea.vmem [#allocation2], %s1315_s11  ;;  %s1083_s21 = scalar_lea.sflag [#allocation3], %s283_s9 }
  0x1c   : > { %1345 = vmatmul.msk.f32.vlgmr.msra.gmra.mxu3 %vm359_vm0, %v350_v4  ;;  %v329_v13 = vld [vmem:[%s1594_s13 + $0x18] sm:$0xff]  ;;  %v330_v17 = vld [vmem:[%s1594_s13 + $0x20] sm:$0xff]  ;;  %v331_v21 = vld [vmem:[%s1594_s13 + $0x28] sm:$0xff]  ;;  %s1106_s17 = sshll.u32 %s285_s16, 4  ;;  %s1107_s17 = int_to_ptr.vmem [resolvable:$true] %s1106_s17 }
  0x1d   : > { %v337_v14 = vld [vmem:[%s1594_s13 + $0x58] sm:$0xff]  ;;  %v338_v18 = vld [vmem:[%s1594_s13 + $0x60] sm:$0xff]  ;;  %v339_v22 = vld [vmem:[%s1594_s13 + $0x68] sm:$0xff] }
  0x1e   : > { %v345_v15 = vld [vmem:[%s1594_s13 + $0x98] sm:$0xff]  ;;  %v346_v19 = vld [vmem:[%s1594_s13 + $0xa0] sm:$0xff]  ;;  %v347_v23 = vld [vmem:[%s1594_s13 + $0xa8] sm:$0xff] }
  0x1f   : > { %v353_v16 = vld [vmem:[%s1594_s13 + $0xd8] sm:$0xff]  ;;  %v354_v20 = vld [vmem:[%s1594_s13 + $0xe0] sm:$0xff]  ;;  %v355_v24 = vld [vmem:[%s1594_s13 + $0xe8] sm:$0xff] }
  0x20   : > { %v332_v25 = vld [vmem:[%s1594_s13 + $0x30] sm:$0xff]  ;;  %v333_v29 = vld [vmem:[%s1594_s13 + $0x38] sm:$0xff] }
  0x21   : > { %1322 = vmatmul.msk.f32.gmra.mxu0 %vm359_vm0, %v327_v5  ;;  %v340_v26 = vld [vmem:[%s1594_s13 + $0x70] sm:$0xff]  ;;  %v341_v30 = vld [vmem:[%s1594_s13 + $0x78] sm:$0xff] }
  0x22   : > { %1330 = vmatmul.msk.f32.gmra.mxu1 %vm359_vm0, %v335_v6  ;;  %v348_v27 = vld [vmem:[%s1594_s13 + $0xb0] sm:$0xff]  ;;  %v349_v31 = vld [vmem:[%s1594_s13 + $0xb8] sm:$0xff] }
  0x23   : > { %1338 = vmatmul.msk.f32.gmra.mxu2 %vm359_vm0, %v343_v7  ;;  %v356_v28 = vld [vmem:[%s1594_s13 + $0xf0] sm:$0xff]  ;;  %v357_v32 = vld [vmem:[%s1594_s13 + $0xf8] sm:$0xff] }
  0x24   : > { %1346 = vmatmul.msk.f32.gmra.mxu3 %vm359_vm0, %v351_v8 }
  0x29   : > { %1323 = vmatmul.msk.f32.gmra.mxu0 %vm359_vm0, %v328_v9 }
  0x2a   : > { %1331 = vmatmul.msk.f32.gmra.mxu1 %vm359_vm0, %v336_v10 }
  0x2b   : > { %1339 = vmatmul.msk.f32.gmra.mxu2 %vm359_vm0, %v344_v11 }
  0x2c   : > { %1347 = vmatmul.msk.f32.gmra.mxu3 %vm359_vm0, %v352_v12 }
  0x31   : > { %1324 = vmatmul.msk.f32.gmra.mxu0 %vm359_vm0, %v329_v13 }
  0x32   : > { %1332 = vmatmul.msk.f32.gmra.mxu1 %vm359_vm0, %v337_v14 }
  0x33   : > { %1340 = vmatmul.msk.f32.gmra.mxu2 %vm359_vm0, %v345_v15 }
  0x34   : > { %1348 = vmatmul.msk.f32.gmra.mxu3 %vm359_vm0, %v353_v16 }
  0x39   : > { %1325 = vmatmul.msk.f32.gmra.mxu0 %vm359_vm0, %v330_v17 }
  0x3a   : > { %1333 = vmatmul.msk.f32.gmra.mxu1 %vm359_vm0, %v338_v18 }
  0x3b   : > { %1341 = vmatmul.msk.f32.gmra.mxu2 %vm359_vm0, %v346_v19 }
  0x3c   : > { %1349 = vmatmul.msk.f32.gmra.mxu3 %vm359_vm0, %v354_v20 }
  0x41   : > { %1326 = vmatmul.msk.f32.gmra.mxu0 %vm359_vm0, %v331_v21 }
  0x42   : > { %1334 = vmatmul.msk.f32.gmra.mxu1 %vm359_vm0, %v339_v22 }
  0x43   : > { %1342 = vmatmul.msk.f32.gmra.mxu2 %vm359_vm0, %v347_v23 }
  0x44   : > { %1350 = vmatmul.msk.f32.gmra.mxu3 %vm359_vm0, %v355_v24 }
  0x49   : > { %1327 = vmatmul.msk.f32.gmra.mxu0 %vm359_vm0, %v332_v25 }
  0x4a   : > { %1335 = vmatmul.msk.f32.gmra.mxu1 %vm359_vm0, %v340_v26 }
  0x4b   : > { %1343 = vmatmul.msk.f32.gmra.mxu2 %vm359_vm0, %v348_v27 }
  0x4c   : > { %1351 = vmatmul.msk.f32.gmra.mxu3 %vm359_vm0, %v356_v28 }
  0x51   : > { %1328 = vmatmul.msk.f32.gmra.mxu0 %vm359_vm0, %v333_v29 }
  0x52   : > { %1336 = vmatmul.msk.f32.gmra.mxu1 %vm359_vm0, %v341_v30 }
  0x53   : > { %1344 = vmatmul.msk.f32.gmra.mxu2 %vm359_vm0, %v349_v31 }
  0x54   : > { %1352 = vmatmul.msk.f32.gmra.mxu3 %vm359_vm0, %v357_v32 }
  0x96   : > { %v473_v33 = vpop.f32.mrf.mxu0 }
  0x97   : > { %v497_v34 = vpop.f32.mrf.mxu1  ;;  %vm569_vm1 = vcmp.ge.f32.partialorder %v473_v33, 0.0  ;;  %v601_v35 = vmul.f32 0.1, %v473_v33 }
  0x98   : > { %vm577_vm2 = vcmp.ge.f32.partialorder %v497_v34, 0.0  ;;  %v609_v36 = vmul.f32 0.1, %v497_v34 }
  0x99   : > { %v1662_v37 = vsel %vm569_vm1, %v473_v33, %v601_v35 }
  0x9a   : > { %v1664_v38 = vsel %vm577_vm2, %v497_v34, %v609_v36  ;;  %v872_v39 = vrot.slane %v1662_v37, 7  ;;  %v666_v35 = vsel %vm665_vm4, %v1662_v37, 0.0  ;;  %v735_v36 = vmul.f32 %v1662_v37, %v1662_v37 }
  0x9b   : > { %v884_v40 = vrot.slane %v1664_v38, 7 }
  0x9c   : > { %v968_v41 = vsel %vm836_vm3, 0.0, %v872_v39 }
  0x9d   : > { %1000 = vst.msk [vmem:[%s1669_s24] sm:$0xff] %vm665_vm4, %v968_v41  ;;  %v972_v42 = vsel %vm836_vm3, 0.0, %v884_v40 }
  0x9e   : > { %v521_v43 = vpop.f32.mrf.mxu2  ;;  %1048 = vst.msk [vmem:[%s1677_s29] sm:$0xff] %vm665_vm4, %v968_v41  ;;  %v476_v44 = vpop.f32.mrf.mxu0 }
  0x9f   : > { %v500_v45 = vpop.f32.mrf.mxu1  ;;  %vm585_vm5 = vcmp.ge.f32.partialorder %v521_v43, 0.0  ;;  %v617_v46 = vmul.f32 0.1, %v521_v43  ;;  %1012 = vst.msk [vmem:[%s1669_s24 + $0x60] sm:$0xff] %vm665_vm4, %v972_v42  ;;  %vm570_vm6 = vcmp.ge.f32.partialorder %v476_v44, 0.0  ;;  %v545_v49 = vpop.f32.mrf.mxu3 }
  0xa0   : > { %v602_v47 = vmul.f32 0.1, %v476_v44  ;;  %vm578_vm7 = vcmp.ge.f32.partialorder %v500_v45, 0.0  ;;  %v610_v48 = vmul.f32 0.1, %v500_v45  ;;  %vm593_vm12 = vcmp.ge.f32.partialorder %v545_v49, 0.0 }
  0xa1   : > { %v1690_v51 = vsel %vm585_vm5, %v521_v43, %v617_v46  ;;  %v625_v11 = vmul.f32 0.1, %v545_v49 }
  0xa2   : > { %v1688_v50 = vsel %vm570_vm6, %v476_v44, %v602_v47  ;;  %v1693_v53 = vsel %vm578_vm7, %v500_v45, %v610_v48  ;;  %v896_v57 = vrot.slane %v1690_v51, 7  ;;  %v1779_v47 = vsel %vm665_vm4, %v1664_v38, 0.0 }
  0xa3   : > { %v873_v52 = vrot.slane %v1688_v50, 7  ;;  %v885_v54 = vrot.slane %v1693_v53, 7  ;;  %v1737_v21 = vsel %vm593_vm12, %v545_v49, %v625_v11  ;;  %v736_v48 = vmul.f32 %v1688_v50, %v1688_v50 }
  0xa4   : > { %v976_v2 = vsel %vm836_vm3, 0.0, %v896_v57  ;;  %v908_v28 = vrot.slane %v1737_v21, 7 }
  0xa5   : > { %v874_v55 = vsel %vm836_vm3, %v872_v39, %v873_v52  ;;  %v984_v56 = vsel %vm836_vm3, %v873_v52, 0.0  ;;  %v886_v59 = vsel %vm836_vm3, %v884_v40, %v885_v54  ;;  %v988_v63 = vsel %vm836_vm3, %v885_v54, 0.0  ;;  %1024 = vst.msk [vmem:[%s1669_s24 + $0xc0] sm:$0xff] %vm665_vm4, %v976_v2 }
  0xa6   : > { %1001 = vst.msk [vmem:[%s1669_s24 + $0x8] sm:$0xff] %vm665_vm4, %v874_v55  ;;  %v524_v58 = vpop.f32.mrf.mxu2  ;;  %v479_v60 = vpop.f32.mrf.mxu0  ;;  %v743_v39 = vmul.f32 %v1664_v38, %v1664_v38  ;;  %v980_v37 = vsel %vm836_vm3, 0.0, %v908_v28  ;;  %v667_v52 = vsel %vm665_vm4, %v1688_v50, 0.0 }
  0xa7   : > { %1002 = vst.msk [vmem:[%s1669_s24 + $0x10] sm:$0x3] %vm838_vm8, %v984_v56  ;;  %v503_v61 = vpop.f32.mrf.mxu1  ;;  %vm586_vm9 = vcmp.ge.f32.partialorder %v524_v58, 0.0  ;;  %v618_v62 = vmul.f32 0.1, %v524_v58  ;;  %vm571_vm10 = vcmp.ge.f32.partialorder %v479_v60, 0.0  ;;  %v1712_v4 = vpop.f32.mrf.mxu3 }
  0xa8   : > { %1049 = vst.msk [vmem:[%s1677_s29 + $0x8] sm:$0xff] %vm665_vm4, %v874_v55  ;;  %v603_v0 = vmul.f32 0.1, %v479_v60  ;;  %vm579_vm11 = vcmp.ge.f32.partialorder %v503_v61, 0.0  ;;  %v611_v1 = vmul.f32 0.1, %v503_v61 }
  0xa9   : > { %1050 = vst.msk [vmem:[%s1677_s29 + $0x10] sm:$0x3] %vm838_vm8, %v984_v56  ;;  %v1710_v3 = vsel %vm586_vm9, %v524_v58, %v618_v62  ;;  %v626_v38 = vmul.f32 0.1, %v1712_v4  ;;  %v767_v56 = vsel %vm665_vm4, %v735_v36, 0.0  ;;  %vm594_vm5 = vcmp.ge.f32.partialorder %v1712_v4, 0.0 }
  0xaa   : > { %1013 = vst.msk [vmem:[%s1669_s24 + $0x68] sm:$0xff] %vm665_vm4, %v886_v59  ;;  %v1716_v5 = vsel %vm571_vm10, %v479_v60, %v603_v0  ;;  %v897_v6 = vrot.slane %v1710_v3, 7  ;;  %v1722_v8 = vsel %vm579_vm11, %v503_v61, %v611_v1  ;;  %v1805_v59 = vmul.f32 %v1690_v51, %v1690_v51 }
  0xab   : > { %1014 = vst.msk [vmem:[%s1669_s24 + $0x70] sm:$0x3] %vm838_vm8, %v988_v63  ;;  %v875_v7 = vrot.slane %v1716_v5, 7  ;;  %v887_v9 = vrot.slane %v1722_v8, 7  ;;  %v737_v50 = vmul.f32 %v1716_v5, %v1716_v5  ;;  %v668_v62 = vadd.f32 %v667_v52, %v666_v35 }
  0xac   : > { %v898_v13 = vsel %vm836_vm3, %v896_v57, %v897_v6  ;;  %v992_v17 = vsel %vm836_vm3, %v897_v6, 0.0  ;;  %1036 = vst.msk [vmem:[%s1669_s24 + $0x120] sm:$0xff] %vm665_vm4, %v980_v37  ;;  %v1797_v57 = vsel %vm665_vm4, %v743_v39, 0.0  ;;  %v768_v63 = vsel %vm665_vm4, %v736_v48, 0.0 }
  0xad   : > { %v969_v10 = vsel %vm836_vm3, 0.0, %v875_v7  ;;  %v973_v12 = vsel %vm836_vm3, 0.0, %v887_v9  ;;  %1025 = vst.msk [vmem:[%s1669_s24 + $0xc8] sm:$0xff] %vm665_vm4, %v898_v13  ;;  %v1813_v0 = vsel %vm665_vm4, %v1693_v53, 0.0  ;;  %v744_v6 = vmul.f32 %v1693_v53, %v1693_v53 }
  0xae   : > { %1003 = vst.msk [vmem:[%s1669_s24 + $0x18] sm:$0xff] %vm665_vm4, %v969_v10  ;;  %v527_v14 = vpop.f32.mrf.mxu2  ;;  %v482_v15 = vpop.f32.mrf.mxu0 }
  0xaf   : > { %1015 = vst.msk [vmem:[%s1669_s24 + $0x78] sm:$0xff] %vm665_vm4, %v973_v12  ;;  %v506_v16 = vpop.f32.mrf.mxu1  ;;  %vm587_vm13 = vcmp.ge.f32.partialorder %v527_v14, 0.0  ;;  %v619_v18 = vmul.f32 0.1, %v527_v14  ;;  %vm572_vm14 = vcmp.ge.f32.partialorder %v482_v15, 0.0  ;;  %v1739_v22 = vpop.f32.mrf.mxu3  ;;  %v1828_v12 = vsel %vm594_vm5, %v1712_v4, %v626_v38 }
  0xb0   : > { %v604_v19 = vmul.f32 0.1, %v482_v15  ;;  %vm580_vm15 = vcmp.ge.f32.partialorder %v506_v16, 0.0  ;;  %v612_v20 = vmul.f32 0.1, %v506_v16  ;;  %v909_v4 = vrot.slane %v1828_v12, 7 }
  0xb1   : > { %1026 = vst.msk [vmem:[%s1669_s24 + $0xd0] sm:$0x3] %vm838_vm8, %v992_v17  ;;  %v1747_v25 = vsel %vm587_vm13, %v527_v14, %v619_v18  ;;  %v769_v14 = vadd.f32 %v768_v63, %v767_v56  ;;  %v745_v17 = vmul.f32 %v1722_v8, %v1722_v8  ;;  %vm595_vm9 = vcmp.ge.f32.partialorder %v1739_v22, 0.0 }
  0xb2   : > { %v1741_v23 = vsel %vm572_vm14, %v482_v15, %v604_v19  ;;  %v1743_v24 = vsel %vm580_vm15, %v506_v16, %v612_v20  ;;  %v899_v31 = vrot.slane %v1747_v25, 7  ;;  %v996_v37 = vsel %vm836_vm3, %v909_v4, 0.0 }
  0xb3   : > { %v876_v26 = vrot.slane %v1741_v23, 7  ;;  %v888_v27 = vrot.slane %v1743_v24, 7  ;;  %v738_v35 = vmul.f32 %v1741_v23, %v1741_v23  ;;  %v1864_v39 = vsel %vm665_vm4, %v745_v17, 0.0  ;;  %1038 = vst.msk [vmem:[%s1669_s24 + $0x130] sm:$0x3] %vm838_vm8, %v996_v37 }
  0xb4   : > { %v977_v42 = vsel %vm836_vm3, 0.0, %v899_v31 }
  0xb5   : > { %v877_v29 = vsel %vm836_vm3, %v875_v7, %v876_v26  ;;  %v985_v30 = vsel %vm836_vm3, %v876_v26, 0.0  ;;  %v889_v32 = vsel %vm836_vm3, %v887_v9, %v888_v27  ;;  %v989_v33 = vsel %vm836_vm3, %v888_v27, 0.0  ;;  %1027 = vst.msk [vmem:[%s1669_s24 + $0xd8] sm:$0xff] %vm665_vm4, %v977_v42 }
  0xb6   : > { %1004 = vst.msk [vmem:[%s1669_s24 + $0x20] sm:$0xff] %vm665_vm4, %v877_v29  ;;  %v530_v34 = vpop.f32.mrf.mxu2  ;;  %v485_v40 = vpop.f32.mrf.mxu0  ;;  %v669_v7 = vsel %vm665_vm4, %v1716_v5, 0.0  ;;  %v770_v5 = vsel %vm665_vm4, %v737_v50, 0.0  ;;  %v1843_v26 = vsel %vm665_vm4, %v744_v6, 0.0  ;;  %v1847_v29 = vsel %vm665_vm4, %v1722_v8, 0.0 }
  0xb7   : > { %1005 = vst.msk [vmem:[%s1669_s24 + $0x28] sm:$0x3] %vm838_vm8, %v985_v30  ;;  %v509_v41 = vpop.f32.mrf.mxu1  ;;  %vm573_vm0 = vcmp.ge.f32.partialorder %v485_v40, 0.0  ;;  %v605_v43 = vmul.f32 0.1, %v485_v40  ;;  %v1775_v46 = vpop.f32.mrf.mxu3  ;;  %vm588_vm2 = vcmp.ge.f32.partialorder %v530_v34, 0.0  ;;  %v670_v27 = vadd.f32 %v669_v7, %v668_v62 }
  0xb8   : > { %1016 = vst.msk [vmem:[%s1669_s24 + $0x80] sm:$0xff] %vm665_vm4, %v889_v32  ;;  %vm581_vm1 = vcmp.ge.f32.partialorder %v509_v41, 0.0  ;;  %v613_v44 = vmul.f32 0.1, %v509_v41  ;;  %v620_v45 = vmul.f32 0.1, %v530_v34 }
  0xb9   : > { %1017 = vst.msk [vmem:[%s1669_s24 + $0x88] sm:$0x3] %vm838_vm8, %v989_v33  ;;  %v1783_v49 = vsel %vm573_vm0, %v485_v40, %v605_v43  ;;  %v910_v33 = vsel %vm836_vm3, %v908_v28, %v909_v4  ;;  %v671_v42 = vsel %vm665_vm4, %v1741_v23, 0.0  ;;  %vm596_vm0 = vcmp.ge.f32.partialorder %v1775_v46, 0.0 }
  0xba   : > { %v878_v54 = vrot.slane %v1783_v49, 7  ;;  %v1790_v55 = vsel %vm581_vm1, %v509_v41, %v613_v44  ;;  %v1808_v61 = vsel %vm588_vm2, %v530_v34, %v620_v45  ;;  %v627_v34 = vmul.f32 0.1, %v1739_v22  ;;  %1037 = vst.msk [vmem:[%s1669_s24 + $0x128] sm:$0xff] %vm665_vm4, %v910_v33 }
  0xbb   : > { %v890_v58 = vrot.slane %v1790_v55, 7  ;;  %v900_v11 = vrot.slane %v1808_v61, 7  ;;  %v739_v43 = vmul.f32 %v1783_v49, %v1783_v49  ;;  %v673_v38 = vsel %vm665_vm4, %v1783_v49, 0.0 }
  0xbc   : > { %v970_v60 = vsel %vm836_vm3, 0.0, %v878_v54  ;;  %v1882_v23 = vsel %vm595_vm9, %v1739_v22, %v627_v34  ;;  %v672_v50 = vadd.f32 %v671_v42, %v670_v27  ;;  %v746_v22 = vmul.f32 %v1743_v24, %v1743_v24 }
  0xbd   : > { %1006 = vst.msk [vmem:[%s1669_s24 + $0x30] sm:$0xff] %vm665_vm4, %v970_v60  ;;  %v974_v1 = vsel %vm836_vm3, 0.0, %v890_v58  ;;  %v901_v15 = vsel %vm836_vm3, %v899_v31, %v900_v11  ;;  %v993_v16 = vsel %vm836_vm3, %v900_v11, 0.0  ;;  %v771_v31 = vadd.f32 %v770_v5, %v769_v14 }
  0xbe   : > { %v533_v2 = vpop.f32.mrf.mxu2  ;;  %1018 = vst.msk [vmem:[%s1669_s24 + $0x90] sm:$0xff] %vm665_vm4, %v974_v1  ;;  %v488_v9 = vpop.f32.mrf.mxu0  ;;  %v911_v49 = vrot.slane %v1882_v23, 7  ;;  %v628_v33 = vmul.f32 0.1, %v1775_v46 }
  0xbf   : > { %v512_v10 = vpop.f32.mrf.mxu1  ;;  %vm574_vm6 = vcmp.ge.f32.partialorder %v488_v9, 0.0  ;;  %v606_v13 = vmul.f32 0.1, %v488_v9  ;;  %1028 = vst.msk [vmem:[%s1669_s24 + $0xe0] sm:$0xff] %vm665_vm4, %v901_v15  ;;  %v1840_v20 = vpop.f32.mrf.mxu3  ;;  %vm589_vm10 = vcmp.ge.f32.partialorder %v533_v2, 0.0 }
  0xc0   : > { %vm582_vm7 = vcmp.ge.f32.partialorder %v512_v10, 0.0  ;;  %v614_v53 = vmul.f32 0.1, %v512_v10  ;;  %1029 = vst.msk [vmem:[%s1669_s24 + $0xe8] sm:$0x3] %vm838_vm8, %v993_v16  ;;  %v981_v27 = vsel %vm836_vm3, 0.0, %v911_v49 }
  0xc1   : > { %v638_v18 = vsel %vm574_vm6, %v488_v9, %v606_v13  ;;  %v621_v48 = vmul.f32 0.1, %v533_v2  ;;  %v774_v9 = vsel %vm665_vm4, %v739_v43, 0.0  ;;  %1039 = vst.msk [vmem:[%s1669_s24 + $0x138] sm:$0xff] %vm665_vm4, %v981_v27  ;;  %vm597_vm2 = vcmp.ge.f32.partialorder %v1840_v20, 0.0 }
  0xc2   : > { %v1835_v19 = vsel %vm582_vm7, %v512_v10, %v614_v53  ;;  %v879_v30 = vrot.slane %v638_v18, 7  ;;  %v740_v60 = vmul.f32 %v638_v18, %v638_v18  ;;  %v675_v13 = vsel %vm665_vm4, %v638_v18, 0.0 }
  0xc3   : > { %v891_v32 = vrot.slane %v1835_v19, 7 }
  0xc4   : > { %v880_v36 = vsel %vm836_vm3, %v878_v54, %v879_v30  ;;  %v986_v8 = vsel %vm836_vm3, %v879_v30, 0.0  ;;  %v772_v54 = vsel %vm665_vm4, %v738_v35, 0.0  ;;  %v776_v15 = vsel %vm665_vm4, %v740_v60, 0.0 }
  0xc5   : > { %1007 = vst.msk [vmem:[%s1669_s24 + $0x38] sm:$0xff] %vm665_vm4, %v880_v36  ;;  %v892_v28 = vsel %vm836_vm3, %v890_v58, %v891_v32  ;;  %v990_v40 = vsel %vm836_vm3, %v891_v32, 0.0  ;;  %v1890_v58 = vsel %vm589_vm10, %v533_v2, %v621_v48  ;;  %v773_v7 = vadd.f32 %v772_v54, %v771_v31 }
  0xc6   : > { %v536_v41 = vpop.f32.mrf.mxu2  ;;  %1008 = vst.msk [vmem:[%s1669_s24 + $0x40] sm:$0x3] %vm838_vm8, %v986_v8  ;;  %v491_v44 = vpop.f32.mrf.mxu0  ;;  %v902_v63 = vrot.slane %v1890_v58, 7  ;;  %v674_v2 = vadd.f32 %v673_v38, %v672_v50 }
  0xc7   : > { %v515_v45 = vpop.f32.mrf.mxu1  ;;  %1019 = vst.msk [vmem:[%s1669_s24 + $0x98] sm:$0xff] %vm665_vm4, %v892_v28  ;;  %vm575_vm11 = vcmp.ge.f32.partialorder %v491_v44, 0.0  ;;  %v607_v52 = vmul.f32 0.1, %v491_v44  ;;  %v1902_v11 = vpop.f32.mrf.mxu3  ;;  %vm590_vm13 = vcmp.ge.f32.partialorder %v536_v41, 0.0  ;;  %v775_v18 = vadd.f32 %v774_v9, %v773_v7 }
  0xc8   : > { %vm583_vm12 = vcmp.ge.f32.partialorder %v515_v45, 0.0  ;;  %1020 = vst.msk [vmem:[%s1669_s24 + $0xa0] sm:$0x3] %vm838_vm8, %v990_v40  ;;  %v615_v56 = vmul.f32 0.1, %v515_v45  ;;  %v978_v5 = vsel %vm836_vm3, 0.0, %v902_v63  ;;  %v676_v34 = vadd.f32 %v675_v13, %v674_v2 }
  0xc9   : > { %v639_v62 = vsel %vm575_vm11, %v491_v44, %v607_v52  ;;  %v622_v32 = vmul.f32 0.1, %v536_v41  ;;  %1030 = vst.msk [vmem:[%s1669_s24 + $0xf0] sm:$0xff] %vm665_vm4, %v978_v5  ;;  %v777_v40 = vadd.f32 %v776_v15, %v775_v18  ;;  %vm598_vm6 = vcmp.ge.f32.partialorder %v1902_v11, 0.0 }
  0xca   : > { %v881_v1 = vrot.slane %v639_v62, 7  ;;  %v1897_v6 = vsel %vm583_vm12, %v515_v45, %v615_v56  ;;  %v741_v53 = vmul.f32 %v639_v62, %v639_v62  ;;  %v677_v16 = vsel %vm665_vm4, %v639_v62, 0.0 }
  0xcb   : > { %v893_v10 = vrot.slane %v1897_v6, 7  ;;  %v1926_v28 = vsel %vm590_vm13, %v536_v41, %v622_v32  ;;  %v678_v42 = vadd.f32 %v677_v16, %v676_v34  ;;  %v1935_v56 = vsel %vm596_vm0, %v1775_v46, %v628_v33 }
  0xcc   : > { %v971_v14 = vsel %vm836_vm3, 0.0, %v881_v1  ;;  %v778_v36 = vsel %vm665_vm4, %v741_v53, 0.0  ;;  %v903_v37 = vrot.slane %v1926_v28, 7  ;;  %v687_v46 = vsel %vm665_vm4, %v1743_v24, 0.0 }
  0xcd   : > { %1009 = vst.msk [vmem:[%s1669_s24 + $0x48] sm:$0xff] %vm665_vm4, %v971_v14  ;;  %v975_v17 = vsel %vm836_vm3, 0.0, %v893_v10  ;;  %v779_v54 = vadd.f32 %v778_v36, %v777_v40  ;;  %v747_v16 = vmul.f32 %v1790_v55, %v1790_v55  ;;  %v689_v33 = vsel %vm665_vm4, %v1790_v55, 0.0 }
  0xce   : > { %v539_v4 = vpop.f32.mrf.mxu2  ;;  %1021 = vst.msk [vmem:[%s1669_s24 + $0xa8] sm:$0xff] %vm665_vm4, %v975_v17  ;;  %v494_v30 = vpop.f32.mrf.mxu0  ;;  %v994_v24 = vsel %vm836_vm3, %v903_v37, 0.0 }
  0xcf   : > { %v518_v31 = vpop.f32.mrf.mxu1  ;;  %vm576_vm14 = vcmp.ge.f32.partialorder %v494_v30, 0.0  ;;  %v608_v35 = vmul.f32 0.1, %v494_v30  ;;  %v623_v7 = vmul.f32 0.1, %v539_v4  ;;  %vm591_vm1 = vcmp.ge.f32.partialorder %v539_v4, 0.0  ;;  %v1944_v53 = vpop.f32.mrf.mxu3 }
  0xd0   : > { %vm584_vm15 = vcmp.ge.f32.partialorder %v518_v31, 0.0  ;;  %v616_v8 = vmul.f32 0.1, %v518_v31  ;;  %1032 = vst.msk [vmem:[%s1669_s24 + $0x100] sm:$0x3] %vm838_vm8, %v994_v24  ;;  %v790_v34 = vsel %vm665_vm4, %v747_v16, 0.0 }
  0xd1   : > { %v640_v43 = vsel %vm576_vm14, %v494_v30, %v608_v35  ;;  %v1965_v17 = vsel %vm591_vm1, %v539_v4, %v623_v7  ;;  %v749_v4 = vmul.f32 %v1897_v6, %v1897_v6  ;;  %v691_v35 = vsel %vm665_vm4, %v1835_v19, 0.0 }
  0xd2   : > { %v679_v44 = vsel %vm665_vm4, %v640_v43, 0.0  ;;  %v742_v45 = vmul.f32 %v640_v43, %v640_v43  ;;  %v882_v48 = vrot.slane %v640_v43, 7  ;;  %v1931_v52 = vsel %vm584_vm15, %v518_v31, %v616_v8 }
  0xd3   : > { %v680_v38 = vadd.f32 %v679_v44, %v678_v42  ;;  %v894_v41 = vrot.slane %v1931_v52, 7  ;;  %v905_v31 = vrot.slane %v1965_v17, 7  ;;  %v693_v42 = vsel %vm665_vm4, %v1897_v6, 0.0 }
  0xd4   : > { %v780_v50 = vsel %vm665_vm4, %v742_v45, 0.0  ;;  %v883_v60 = vsel %vm836_vm3, %v881_v1, %v882_v48  ;;  %v987_v62 = vsel %vm836_vm3, %v882_v48, 0.0  ;;  %v788_v1 = vsel %vm665_vm4, %v746_v22, 0.0 }
  0xd5   : > { %v682_v2 = vadd.f32 %v1779_v47, %v680_v38  ;;  %v781_v9 = vadd.f32 %v780_v50, %v779_v54  ;;  %1010 = vst.msk [vmem:[%s1669_s24 + $0x50] sm:$0xff] %vm665_vm4, %v883_v60  ;;  %v895_v13 = vsel %vm836_vm3, %v893_v10, %v894_v41  ;;  %v991_v14 = vsel %vm836_vm3, %v894_v41, 0.0 }
  0xd6   : > { %1011 = vst.msk [vmem:[%s1669_s24 + $0x58] sm:$0x3] %vm838_vm8, %v987_v62  ;;  %v904_v47 = vsel %vm836_vm3, %v902_v63, %v903_v37  ;;  %v912_v22 = vrot.slane %v1935_v56, 7  ;;  %v542_v15 = vpop.f32.mrf.mxu2  ;;  %v979_v36 = vsel %vm836_vm3, 0.0, %v905_v31  ;;  %v750_v54 = vmul.f32 %v1931_v52, %v1931_v52 }
  0xd7   : > { %v684_v5 = vadd.f32 %v1813_v0, %v682_v2  ;;  %v783_v10 = vadd.f32 %v1797_v57, %v781_v9  ;;  %1022 = vst.msk [vmem:[%s1669_s24 + $0xb0] sm:$0xff] %vm665_vm4, %v895_v13  ;;  %v629_v57 = vmul.f32 0.1, %v1840_v20  ;;  %v748_v0 = vmul.f32 %v1835_v19, %v1835_v19  ;;  %v566_v48 = vpop.f32.mrf.mxu3 }
  0xd8   : > { %1023 = vst.msk [vmem:[%s1669_s24 + $0xb8] sm:$0x3] %vm838_vm8, %v991_v14  ;;  %v913_v27 = vsel %vm836_vm3, %v911_v49, %v912_v22  ;;  %v997_v30 = vsel %vm836_vm3, %v912_v22, 0.0  ;;  %vm592_vm5 = vcmp.ge.f32.partialorder %v542_v15, 0.0  ;;  %v624_v49 = vmul.f32 0.1, %v542_v15 }
  0xd9   : > { %v686_v63 = vadd.f32 %v1847_v29, %v684_v5  ;;  %v785_v18 = vadd.f32 %v1843_v26, %v783_v10  ;;  %1031 = vst.msk [vmem:[%s1669_s24 + $0xf8] sm:$0xff] %vm665_vm4, %v904_v47  ;;  %v1988_v32 = vsel %vm597_vm2, %v1840_v20, %v629_v57  ;;  %v792_v55 = vsel %vm665_vm4, %v748_v0, 0.0 }
  0xda   : > { %1040 = vst.msk [vmem:[%s1669_s24 + $0x140] sm:$0xff] %vm665_vm4, %v913_v27  ;;  %v914_v20 = vrot.slane %v1988_v32, 7  ;;  %v2001_v40 = vsel %vm592_vm5, %v542_v15, %v624_v49  ;;  %v794_v19 = vsel %vm665_vm4, %v749_v4, 0.0  ;;  %v630_v41 = vmul.f32 0.1, %v1902_v11 }
  0xdb   : > { %v787_v26 = vadd.f32 %v1864_v39, %v785_v18  ;;  %v688_v29 = vadd.f32 %v687_v46, %v686_v63  ;;  %1041 = vst.msk [vmem:[%s1669_s24 + $0x148] sm:$0x3] %vm838_vm8, %v997_v30  ;;  %v906_v43 = vrot.slane %v2001_v40, 7  ;;  %vm599_vm7 = vcmp.ge.f32.partialorder %v1944_v53, 0.0 }
  0xdc   : > { %1033 = vst.msk [vmem:[%s1669_s24 + $0x108] sm:$0xff] %vm665_vm4, %v979_v36  ;;  %v982_v45 = vsel %vm836_vm3, 0.0, %v914_v20  ;;  %v631_v62 = vmul.f32 0.1, %v1944_v53  ;;  %v695_v7 = vsel %vm665_vm4, %v1931_v52, 0.0  ;;  %v2026_v2 = vsel %vm598_vm6, %v1902_v11, %v630_v41 }
  0xdd   : > { %v690_v39 = vadd.f32 %v689_v33, %v688_v29  ;;  %v789_v8 = vadd.f32 %v788_v1, %v787_v26  ;;  %1042 = vst.msk [vmem:[%s1669_s24 + $0x150] sm:$0xff] %vm665_vm4, %v982_v45  ;;  %v907_v38 = vsel %vm836_vm3, %v905_v31, %v906_v43  ;;  %v995_v6 = vsel %vm836_vm3, %v906_v43, 0.0 }
  0xde   : > { %1034 = vst.msk [vmem:[%s1669_s24 + $0x110] sm:$0xff] %vm665_vm4, %v907_v38  ;;  %vm600_vm9 = vcmp.ge.f32.partialorder %v566_v48, 0.0  ;;  %v632_v9 = vmul.f32 0.1, %v566_v48  ;;  %v697_v13 = vsel %vm665_vm4, %v1690_v51, 0.0  ;;  %v752_v46 = vmul.f32 %v1710_v3, %v1710_v3 }
  0xdf   : > { %v692_v37 = vadd.f32 %v691_v35, %v690_v39  ;;  %v791_v44 = vadd.f32 %v790_v34, %v789_v8  ;;  %1035 = vst.msk [vmem:[%s1669_s24 + $0x118] sm:$0x3] %vm838_vm8, %v995_v6  ;;  %v798_v47 = vsel %vm665_vm4, %v1805_v59, 0.0  ;;  %v796_v52 = vsel %vm665_vm4, %v750_v54, 0.0 }
  0xe0   : > { %v915_v11 = vrot.slane %v2026_v2, 7  ;;  %v2037_v5 = vsel %vm599_vm7, %v1944_v53, %v631_v62  ;;  %v753_v51 = vmul.f32 %v1747_v25, %v1747_v25  ;;  %v2041_v22 = vsel %vm600_vm9, %v566_v48, %v632_v9 }
  0xe1   : > { %v694_v50 = vadd.f32 %v693_v42, %v692_v37  ;;  %v793_v60 = vadd.f32 %v792_v55, %v791_v44  ;;  %v699_v15 = vsel %vm665_vm4, %v1710_v3, 0.0  ;;  %v917_v57 = vrot.slane %v2037_v5, 7 }
  0xe2   : > { %v916_v59 = vsel %vm836_vm3, %v914_v20, %v915_v11  ;;  %v998_v16 = vsel %vm836_vm3, %v915_v11, 0.0  ;;  %v800_v53 = vsel %vm665_vm4, %v752_v46, 0.0  ;;  %v701_v3 = vsel %vm665_vm4, %v1747_v25, 0.0 }
  0xe3   : > { %v696_v1 = vadd.f32 %v695_v7, %v694_v50  ;;  %v795_v14 = vadd.f32 %v794_v19, %v793_v60  ;;  %1043 = vst.msk [vmem:[%s1669_s24 + $0x158] sm:$0xff] %vm665_vm4, %v916_v59  ;;  %v754_v18 = vmul.f32 %v1808_v61, %v1808_v61  ;;  %v983_v27 = vsel %vm836_vm3, 0.0, %v917_v57 }
  0xe4   : > { %1044 = vst.msk [vmem:[%s1669_s24 + $0x160] sm:$0x3] %vm838_vm8, %v998_v16  ;;  %v918_v4 = vrot.slane %v2041_v22, 7  ;;  %v802_v30 = vsel %vm665_vm4, %v753_v51, 0.0  ;;  %v703_v25 = vsel %vm665_vm4, %v1808_v61, 0.0  ;;  %v755_v29 = vmul.f32 %v1890_v58, %v1890_v58 }
  0xe5   : > { %v698_v10 = vadd.f32 %v697_v13, %v696_v1  ;;  %v797_v24 = vadd.f32 %v796_v52, %v795_v14  ;;  %1045 = vst.msk [vmem:[%s1669_s24 + $0x168] sm:$0xff] %vm665_vm4, %v983_v27  ;;  %v804_v36 = vsel %vm665_vm4, %v754_v18, 0.0  ;;  %v705_v39 = vsel %vm665_vm4, %v1890_v58, 0.0 }
  0xe6   : > { %1051 = vst.msk [vmem:[%s325_s10] sm:$0xff] %vm665_vm4, %v983_v27  ;;  %v919_v49 = vsel %vm836_vm3, %v917_v57, %v918_v4  ;;  %v999_v33 = vsel %vm836_vm3, %v918_v4, 0.0  ;;  %v756_v61 = vmul.f32 %v1926_v28, %v1926_v28  ;;  %v806_v55 = vsel %vm665_vm4, %v755_v29, 0.0 }
  0xe7   : > { %v700_v0 = vadd.f32 %v699_v15, %v698_v10  ;;  %v799_v63 = vadd.f32 %v798_v47, %v797_v24  ;;  %1046 = vst.msk [vmem:[%s1669_s24 + $0x170] sm:$0xff] %vm665_vm4, %v919_v49  ;;  %v707_v42 = vsel %vm665_vm4, %v1926_v28, 0.0  ;;  %v757_v19 = vmul.f32 %v1965_v17, %v1965_v17 }
  0xe8   : > { %1047 = vst.msk [vmem:[%s1669_s24 + $0x178] sm:$0x3] %vm838_vm8, %v999_v33  ;;  %v808_v37 = vsel %vm665_vm4, %v756_v61, 0.0  ;;  %v709_v44 = vsel %vm665_vm4, %v1965_v17, 0.0  ;;  %v758_v45 = vmul.f32 %v2001_v40, %v2001_v40  ;;  %v759_v28 = vmul.f32 %v1737_v21, %v1737_v21  ;;  %s1108_s24 = sshll.u32 %s1104_s15, 4  ;;  %s1109_s24 = int_to_ptr.hbm [resolvable:$true] %s1108_s24 }
  0xe9   : > { %v702_v31 = vadd.f32 %v701_v3, %v700_v0  ;;  %v801_v26 = vadd.f32 %v800_v53, %v799_v63  ;;  %1052 = vst.msk [vmem:[%s325_s10 + $0x8] sm:$0xff] %vm665_vm4, %v919_v49  ;;  %v810_v38 = vsel %vm665_vm4, %v757_v19, 0.0  ;;  %v711_v6 = vsel %vm665_vm4, %v2001_v40, 0.0  ;;  %s1432_s25 = sshra.s32 %s1109_s24, 4  ;;  %s1433_s25 = int_to_ptr.hbm [resolvable:$true] %s1432_s25 }
  0xea   : > { %1053 = vst.msk [vmem:[%s325_s10 + $0x10] sm:$0x3] %vm838_vm8, %v999_v33  ;;  %v713_v60 = vsel %vm665_vm4, %v1737_v21, 0.0  ;;  %v760_v17 = vmul.f32 %v1828_v12, %v1828_v12  ;;  %v812_v62 = vsel %vm665_vm4, %v758_v45, 0.0  ;;  %v814_v13 = vsel %vm665_vm4, %v759_v28, 0.0  ;;  %s1434_s27 = scalar_lea.hbm %s1433_s25, 2  ;;  %p1439_p1 = scmp.lt.s32.totalorder %s1433_s25, %s2183_s5 }
  0xeb   : > { %v803_v34 = vadd.f32 %v802_v30, %v801_v26  ;;  %v704_v35 = vadd.f32 %v703_v25, %v702_v31  ;;  %v715_v46 = vsel %vm665_vm4, %v1828_v12, 0.0  ;;  %v761_v40 = vmul.f32 %v1882_v23, %v1882_v23  ;;  %p1435_p12 = scmp.ne.s32.totalorder %s1433_s25, %s1434_s27  ;;  %p1440_p2 = scmp.lt.s32.totalorder %s1438_s8, %s1434_s27 }
  0xec   : > { %v816_v47 = vsel %vm665_vm4, %v760_v17, 0.0  ;;  %v717_v21 = vsel %vm665_vm4, %v1882_v23, 0.0  ;;  %v762_v52 = vmul.f32 %v1935_v56, %v1935_v56  ;;  %v719_v12 = vsel %vm665_vm4, %v1935_v56, 0.0 }
  0xed   : > { %v706_v8 = vadd.f32 %v705_v39, %v704_v35  ;;  %v805_v20 = vadd.f32 %v804_v36, %v803_v34  ;;  %v818_v10 = vsel %vm665_vm4, %v761_v40, 0.0  ;;  %v763_v24 = vmul.f32 %v1988_v32, %v1988_v32  ;;  %p1436_p13 = pnand %p1435_p12, %p1568_p4  ;;  %p1441_p3 = por %p1440_p2, %p1439_p1 }
  0xee   : > { %v820_v16 = vsel %vm665_vm4, %v762_v52, 0.0  ;;  %v721_v23 = vsel %vm665_vm4, %v1988_v32, 0.0  ;;  %v764_v57 = vmul.f32 %v2026_v2, %v2026_v2  ;;  %v723_v56 = vsel %vm665_vm4, %v2026_v2, 0.0 }
  0xef   : > { %v708_v58 = vadd.f32 %v707_v42, %v706_v8  ;;  %v807_v43 = vadd.f32 %v806_v55, %v805_v20  ;;  %v822_v63 = vsel %vm665_vm4, %v763_v24, 0.0  ;;  %v765_v3 = vmul.f32 %v2037_v5, %v2037_v5  ;;  %p1437_p0 = pneg %p1436_p13 }
  0xf0   : > { %v824_v4 = vsel %vm665_vm4, %v764_v57, 0.0  ;;  %v725_v32 = vsel %vm665_vm4, %v2037_v5, 0.0  ;;  %v766_v30 = vmul.f32 %v2041_v22, %v2041_v22  ;;  %v727_v2 = vsel %vm665_vm4, %v2041_v22, 0.0 }
  0xf1   : > { %v809_v48 = vadd.f32 %v808_v37, %v807_v43  ;;  %v710_v54 = vadd.f32 %v709_v44, %v708_v58  ;;  %v826_v25 = vsel %vm665_vm4, %v765_v3, 0.0  ;;  %p1442_p5 = pnand %p1441_p3, %p1437_p0 }
  0xf2   : > { %v828_v33 = vsel %vm665_vm4, %v766_v30, 0.0 }
  0xf3   : > { %v811_v41 = vadd.f32 %v810_v38, %v809_v48  ;;  %v712_v50 = vadd.f32 %v711_v6, %v710_v54 }
  0xf5   : > { %v714_v7 = vadd.f32 %v713_v60, %v712_v50  ;;  %v813_v9 = vadd.f32 %v812_v62, %v811_v41 }
  0xf7   : > { %v716_v1 = vadd.f32 %v715_v46, %v714_v7  ;;  %v815_v14 = vadd.f32 %v814_v13, %v813_v9 }
  0xf9   : > { %v718_v11 = vadd.f32 %v717_v21, %v716_v1  ;;  %v817_v51 = vadd.f32 %v816_v47, %v815_v14 }
  0xfb   : > { %v819_v15 = vadd.f32 %v818_v10, %v817_v51  ;;  %v720_v59 = vadd.f32 %v719_v12, %v718_v11 }
  0xfd   : > { %v722_v53 = vadd.f32 %v721_v23, %v720_v59  ;;  %v821_v0 = vadd.f32 %v820_v16, %v819_v15 }
  0xff   : > { %v724_v18 = vadd.f32 %v723_v56, %v722_v53  ;;  %v823_v27 = vadd.f32 %v822_v63, %v821_v0 }
 0x101   : > { %v825_v31 = vadd.f32 %v824_v4, %v823_v27  ;;  %v726_v26 = vadd.f32 %v725_v32, %v724_v18 }
 0x103   : > { %v827_v29 = vadd.f32 %v826_v25, %v825_v31  ;;  %v728_v49 = vadd.f32 %v727_v2, %v726_v26 }
 0x105   : > { %v729_v34 = vrot.slane %v728_v49, 4  ;;  %v829_v35 = vadd.f32 %v828_v33, %v827_v29 }
 0x107   : > { %v730_v36 = vadd.f32 %v729_v34, %v728_v49  ;;  %v830_v5 = vrot.slane %v829_v35, 4 }
 0x109   : > { %v731_v39 = vrot.slane %v730_v36, 2  ;;  %v831_v61 = vadd.f32 %v830_v5, %v829_v35 }
 0x10b   : > { %v732_v8 = vadd.f32 %v731_v39, %v730_v36  ;;  %v832_v20 = vrot.slane %v831_v61, 2 }
 0x10d   : > { %v733_v22 = vrot.slane %v732_v8, 1  ;;  %v833_v55 = vadd.f32 %v832_v20, %v831_v61 }
 0x10f   : > { %v834_v42 = vrot.slane %v833_v55, 1  ;;  %v734_v19 = vadd.f32 %v733_v22, %v732_v8 }
 0x111   : > { %v835_v58 = vadd.f32 %v834_v42, %v833_v55 }
 0x113   : > { %v837_v43 = vsel %vm836_vm3, %v734_v19, %v835_v58 }
 0x114   : > { %839 = vst.msk [vmem:[%s285_s16] sm:$0x3] %vm838_vm8, %v837_v43 }
 0x115   : > { %1445 = shalt.err (!%p1442_p5)
}
 0x116   : > { %1363 = dma.vmem_to_hbm [thread:$0]  (%p1568_p4), %s1107_s17, 32, %s1109_s24, %s1083_s21  }
 0x117 PF: > { %p1369_p6 = scmp.ge.s32.totalorder %s1496_s23, 2  ;;  %s1157_s9 = sand.u32 1, %s1476_s18  }
 0x118   : > { %s1158_s12 = scalar_lea.sflag [#allocation3], %s1157_s9 }
 0x119   : > { %p1366_p7 = pnand %p1369_p6, %p1575_p8 }
 0x11b   : > { %p1367_p9 = pneg %p1366_p7 }
 0x11d   : > { %1471 = dma.done.wait (%p1367_p9), %s1158_s12, 32  }
 0x11e   : > { %1473 = vsyncadd (%p1367_p9), %s1158_s12, 4294967264  ;;  %s19_s23 = sadd.s32 1, %s1496_s23   ;;  %s2186_s18 = smov %s1480_s19 }
 0x11f   : > { %p16_p10 = scmp.ge.s32.totalorder %s19_s23, 4   ;;  %s2187_s19 = smov %s1484_s20 }
 0x120   : > { %s2188_s20 = smov %s1581_s6  ;;  %s2189_s21 = smov %s1492_s22 }
 0x121   : > { %s2190_s22 = smov %s2192_s26  ;;  %18 = sbr.rel (!%p16_p10) target bundleno = 4 (0x4), region = 99 }
 0x126   :  { %1164 = vsyncpa [#allocation3], 1 }
 0x127   :  { %1166 = vsyncpa [#allocation3 + $0x1], 1 }

</bundles_post_ra>
